<compile_context>
chip_gen: v5e
topology: v5e:2x2
jax: 0.10.0
libtpu: 0.0.40
codegen_flags: <defaults>
</compile_context>

<pallas_src>
import jax
import jax.numpy as jnp
from jax import lax
from jax.experimental import pallas as pl
from jax.experimental.pallas import tpu as pltpu

LANE = 128


def _round_up(a, m):
    return ((a + m - 1) // m) * m


# ----------------------------------------------------------------------------
# Parameter construction (deterministic, mimics nn.Linear shapes / init scale)
# ----------------------------------------------------------------------------
def init_mlps_params(key, dim_in, dim_hidden, n_layers, skips):
    """Returns (params, skip_flags) in torch layout: W is [out, in], b is [out]."""
    skip_flags = tuple(x in skips for x in range(n_layers))

    in_out = [(dim_in, dim_hidden)]
    for i in range(1, n_layers - 1):
        fan_out = dim_hidden - dim_in if skip_flags[i + 1] else dim_hidden
        in_out.append((dim_hidden, fan_out))
    in_out.append((dim_hidden, 1))

    params = []
    for fan_in, fan_out in in_out:
        key, kw, kb = jax.random.split(key, 3)
        bound = 1.0 / float(fan_in) ** 0.5  # same scale as torch default init
        w = jax.random.uniform(kw, (fan_out, fan_in), jnp.float32, -bound, bound)
        b = jax.random.uniform(kb, (fan_out,), jnp.float32, -bound, bound)
        params.append((w, b))
    return params, skip_flags


# ----------------------------------------------------------------------------
# Pack all weights/biases into one resident f32 slab
# ----------------------------------------------------------------------------
def prepare_params(params, skip_flags, dim_in, dim_hidden):
    """Pack every weight/bias into one f32 slab of shape [R, dim_hidden + 1].

    Layer k's weight sits at rows [r0, r0+out), cols [0, fan_in); its bias in
    the last column.  A skip layer's weight is used column-split in the kernel
    (first `prev` cols act on x, trailing dim_in cols on x0), matching
    torch.concat((x, x0), dim=-1).  The last layer's weight is stored as a
    column so the kernel can do a VPU multiply + sublane reduce.
    Row blocks are 8-aligned so every slab slice starts on a sublane boundary.
    """
    C = dim_hidden + 1
    n_hidden = len(params) - 1
    blocks, layout, r = [], [], 0

    for k in range(n_hidden):
        w, b = params[k]
        out, fan_in = w.shape
        rows = _round_up(out, 8)
        blk = jnp.zeros((rows, C), jnp.float32)
        blk = blk.at[:out, :fan_in].set(w.astype(jnp.float32))
        blk = blk.at[:out, C - 1].set(b.astype(jnp.float32))
        layout.append(dict(r0=r, out=out, fan_in=fan_in,
                           prev=(fan_in - dim_in) if skip_flags[k] else None,
                           skip=bool(skip_flags[k])))
        blocks.append(blk)
        r += rows

    w_last, b_last = params[-1]                     # [1, dim_hidden], [1]
    rows = _round_up(dim_hidden, 8)
    blk = jnp.zeros((rows, C), jnp.float32)
    blk = blk.at[:dim_hidden, 0].set(w_last[0].astype(jnp.float32))
    blk = blk.at[0, C - 1].set(b_last[0].astype(jnp.float32))
    layout.append(dict(r0=r, out=1, fan_in=dim_hidden, prev=None, skip=False))
    blocks.append(blk)

    slab = jnp.concatenate(blocks, axis=0)
    return slab, layout


# ----------------------------------------------------------------------------
# Pallas kernel
# ----------------------------------------------------------------------------
def make_mlps_kernel(layout, dim_in, dim_hidden, n_chunks, chunk_n, bias_col):
    """Kernel closure for a fixed (static) layer structure and tiling."""
    hidden = layout[:-1]
    last = layout[-1]
    lane_pieces = chunk_n // LANE

    def kernel(x_ref, slab_ref, o_ref):
        # x_ref   : [tile_n, dim_in]            batch-major input block
        # slab_ref: [R, dim_hidden + 1]         packed parameters (resident)
        # o_ref   : [1, n_chunks, chunk_n]      lane-dense output block

        def process_chunk(c):
            if isinstance(c, int):
                start = c * chunk_n
            else:
                start = pl.multiple_of(c * chunk_n, chunk_n)

            # ---- load the chunk batch-major and relayout to feature-major.
            # Piecewise (128 rows at a time) so the lane-sparse [128, dim_in]
            # transient stays tiny; the lane-axis concat is vreg-aligned
            # (multiples of 128), i.e. free.
            pieces = []
            for p in range(lane_pieces):
                s = start + p * LANE
                if not isinstance(s, int):
                    s = pl.multiple_of(s, LANE)
                xb = x_ref[pl.ds(s, LANE), :].astype(jnp.float32)  # [128, dim_in]
                pieces.append(xb.T)                                # [dim_in, 128]
            x0 = pieces[0] if lane_pieces == 1 else jnp.concatenate(pieces, axis=1)
            x = x0                                                 # [dim_in, chunk_n]

            # ---- hidden layers: h = W @ x (+ W_x0 @ x0) + b, ReLU
            for m in hidden:
                r0, out, fan_in = m["r0"], m["out"], m["fan_in"]
                b = slab_ref[r0:r0 + out, bias_col:bias_col + 1]   # [out, 1]
                if m["skip"]:
                    prev = m["prev"]
                    w_x = slab_ref[r0:r0 + out, 0:prev]            # [out, prev]
                    w_x0 = slab_ref[r0:r0 + out, prev:prev + dim_in]
                    h = (jnp.dot(w_x, x, preferred_element_type=jnp.float32)
                         + jnp.dot(w_x0, x0, preferred_element_type=jnp.float32)
                         + b)
                else:
                    w = slab_ref[r0:r0 + out, 0:fan_in]            # [out, in]
                    h = jnp.dot(w, x, preferred_element_type=jnp.float32) + b
                x = jnp.maximum(h, 0.0)

            # ---- final layer (dim_hidden -> 1): VPU multiply + sublane reduce
            r0 = last["r0"]
            w_col = slab_ref[r0:r0 + dim_hidden, 0:1]              # [dim_hidden, 1]
            b_last = slab_ref[r0:r0 + 1, bias_col:bias_col + 1]    # [1, 1]
            row = jnp.sum(w_col * x, axis=0, keepdims=True) + b_last   # [1, chunk_n]
            o_ref[0, pl.ds(c, 1), :] = row.astype(o_ref.dtype)     # lane-dense store

        if n_chunks == 1:
            process_chunk(0)
        else:
            def body(c, carry):
                process_chunk(c)
                return carry
            lax.fori_loop(0, n_chunks, body, 0)

    return kernel


# ----------------------------------------------------------------------------
# Wrapper
# ----------------------------------------------------------------------------
def mlps_forward(x, params, skip_flags, *, tile_n=2048, chunk_n=512):
    N, dim_in = x.shape
    dim_hidden = params[0][0].shape[0]

    # Tiling: large DMA tile (amortizes per-step overhead), capped so the grid
    # keeps >= 2 parallel steps whenever N > 128 (two v7x TensorCores); the
    # compute chunk bounds the in-kernel live vreg set.
    cap = max(LANE, _round_up(-(-N // 2), LANE))       # ~ceil(N/2), lane-aligned
    tile_n = max(LANE, min(_round_up(tile_n, LANE), cap))
    chunk_n = max(LANE, min(_round_up(chunk_n, LANE), tile_n))
    tile_n = (tile_n // chunk_n) * chunk_n             # inner loop divides evenly
    n_chunks = tile_n // chunk_n
    num_tiles = pl.cdiv(N, tile_n)

    slab, layout = prepare_params(params, skip_flags, dim_in, dim_hidden)
    kernel = make_mlps_kernel(layout, dim_in, dim_hidden, n_chunks, chunk_n,
                              bias_col=dim_hidden)

    out = pl.pallas_call(
        kernel,
        out_shape=jax.ShapeDtypeStruct((num_tiles, n_chunks, chunk_n), x.dtype),
        grid=(num_tiles,),
        in_specs=[
            # batch-major input; ragged final tile: OOB rows are garbage that
            # never mixes across lanes and is sliced off below
            pl.BlockSpec((tile_n, dim_in), lambda i: (i, 0)),
            # single packed parameter slab, resident for the whole grid
            pl.BlockSpec(slab.shape, lambda i: (0, 0)),
        ],
        out_specs=pl.BlockSpec((1, n_chunks, chunk_n), lambda i: (i, 0, 0)),
        compiler_params=pltpu.CompilerParams(
            dimension_semantics=("parallel",)),
    )(x, slab)

    # (num_tiles, n_chunks, chunk_n) row-major == original row order.
    return out.reshape(-1)[:N].reshape(N, 1)


# ----------------------------------------------------------------------------
# Pure-JAX reference (mirrors the torch forward exactly)
# ----------------------------------------------------------------------------
def mlps_reference(x, params, skip_flags):
    x0 = x
    h = x
    n_hidden = len(params) - 1
    for k in range(n_hidden):
        w, b = params[k]
        inp = jnp.concatenate([h, x0], axis=-1) if skip_flags[k] else h
        h = jax.nn.relu(inp @ w.T + b)
    w, b = params[-1]
    return h @ w.T + b


# ----------------------------------------------------------------------------
if __name__ == "__main__":
    # Module config: MultiLayerPerceptronSkips(dim_in=8, dim_hidden=32,
    #                                          n_layers=5, skips=[3])
    dim_in, dim_hidden, n_layers, skips = 8, 32, 5, [3]
    N = 1024  # grid = 2 parallel steps of 512 rows (keeps both v7x TCs busy)

    key = jax.random.PRNGKey(0)
    key, kx = jax.random.split(key)
    x = jax.random.normal(kx, (N, dim_in), dtype=jnp.float32)

    params, skip_flags = init_mlps_params(key, dim_in, dim_hidden, n_layers, skips)

    out = jax.block_until_ready(mlps_forward(x, params, skip_flags))
    ref = mlps_reference(x, params, skip_flags)
    assert out.shape == (N, 1)
    assert jnp.allclose(out, ref, atol=1e-5, rtol=1e-5), "Pallas kernel mismatch"

    # Ragged-N path (no wrapper pad; OOB rows of the final tile are sliced off).
    x2 = jax.random.normal(jax.random.PRNGKey(1), (300, dim_in), dtype=jnp.float32)
    out2 = jax.block_until_ready(mlps_forward(x2, params, skip_flags))
    ref2 = mlps_reference(x2, params, skip_flags)
    assert out2.shape == (300, 1)
    assert jnp.allclose(out2, ref2, atol=1e-5, rtol=1e-5), "Pallas kernel mismatch (ragged N)"

    print("KERNEL_OK")
</pallas_src>

<mosaic_0001>
module attributes {stable_mosaic.version = 11 : i64} {
  func.func @kernel(%arg0: i32, %arg1: memref<512x8xf32, #tpu.memory_space<vmem>>, %arg2: memref<152x33xf32, #tpu.memory_space<vmem>>, %arg3: memref<1x1x512xf32, #tpu.memory_space<vmem>>) attributes {dimension_semantics = [#tpu.dimension_semantics<parallel>], iteration_bounds = array<i64: 2>, scalar_prefetch = 0 : i64, scratch_operands = 0 : i64, tpu.core_type = #tpu.core_type<tc>, window_params = [{transform_indices = @transform_0, window_bounds = array<i64: 512, 8>}, {pipeline_mode = #tpu.pipeline_mode<synchronous>, transform_indices = @transform_1, window_bounds = array<i64: 152, 33>}, {transform_indices = @transform_2, window_bounds = array<i64: 1, 1, 512>}]} {
    %c0 = arith.constant 0 : index
    %c0_0 = arith.constant 0 : index
    %0 = vector.load %arg1[%c0, %c0_0] : memref<512x8xf32, #tpu.memory_space<vmem>>, vector<128x8xf32>
    %1 = tpu.transpose %0, [1, 0] : vector<128x8xf32> -> vector<8x128xf32>
    %c128 = arith.constant 128 : index
    %c0_1 = arith.constant 0 : index
    %2 = vector.load %arg1[%c128, %c0_1] : memref<512x8xf32, #tpu.memory_space<vmem>>, vector<128x8xf32>
    %3 = tpu.transpose %2, [1, 0] : vector<128x8xf32> -> vector<8x128xf32>
    %c256 = arith.constant 256 : index
    %c0_2 = arith.constant 0 : index
    %4 = vector.load %arg1[%c256, %c0_2] : memref<512x8xf32, #tpu.memory_space<vmem>>, vector<128x8xf32>
    %5 = tpu.transpose %4, [1, 0] : vector<128x8xf32> -> vector<8x128xf32>
    %c384 = arith.constant 384 : index
    %c0_3 = arith.constant 0 : index
    %6 = vector.load %arg1[%c384, %c0_3] : memref<512x8xf32, #tpu.memory_space<vmem>>, vector<128x8xf32>
    %7 = tpu.transpose %6, [1, 0] : vector<128x8xf32> -> vector<8x128xf32>
    %8 = tpu.concatenate %1, %3, %5, %7 in 1 : vector<8x128xf32>, vector<8x128xf32>, vector<8x128xf32>, vector<8x128xf32> -> vector<8x512xf32>
    %c0_4 = arith.constant 0 : index
    %c32 = arith.constant 32 : index
    %9 = vector.load %arg2[%c0_4, %c32] : memref<152x33xf32, #tpu.memory_space<vmem>>, vector<32x1xf32>
    %c0_5 = arith.constant 0 : index
    %c0_6 = arith.constant 0 : index
    %10 = vector.load %arg2[%c0_5, %c0_6] : memref<152x33xf32, #tpu.memory_space<vmem>>, vector<32x8xf32>
    %cst = arith.constant dense<0.000000e+00> : vector<32x512xf32>
    %11 = tpu.matmul %10, %8, %cst {dimension_numbers = #tpu.dot_dimension_numbers<[1], [0], [0], [1], [0, 0, 1, 1], [], []>} : vector<32x8xf32>, vector<8x512xf32>, vector<32x512xf32> -> vector<32x512xf32>
    %12 = vector.broadcast %9 : vector<32x1xf32> to vector<32x512xf32>
    %13 = arith.addf %11, %12 : vector<32x512xf32>
    %cst_7 = arith.constant 0.000000e+00 : f32
    %14 = vector.broadcast %cst_7 : f32 to vector<32x512xf32>
    %15 = arith.maximumf %13, %14 : vector<32x512xf32>
    %c32_8 = arith.constant 32 : index
    %c32_9 = arith.constant 32 : index
    %16 = vector.load %arg2[%c32_8, %c32_9] : memref<152x33xf32, #tpu.memory_space<vmem>>, vector<32x1xf32>
    %c32_10 = arith.constant 32 : index
    %c0_11 = arith.constant 0 : index
    %17 = vector.load %arg2[%c32_10, %c0_11] : memref<152x33xf32, #tpu.memory_space<vmem>>, vector<32x32xf32>
    %cst_12 = arith.constant dense<0.000000e+00> : vector<32x512xf32>
    %18 = tpu.matmul %17, %15, %cst_12 {dimension_numbers = #tpu.dot_dimension_numbers<[1], [0], [0], [1], [0, 0, 1, 1], [], []>} : vector<32x32xf32>, vector<32x512xf32>, vector<32x512xf32> -> vector<32x512xf32>
    %19 = vector.broadcast %16 : vector<32x1xf32> to vector<32x512xf32>
    %20 = arith.addf %18, %19 : vector<32x512xf32>
    %cst_13 = arith.constant 0.000000e+00 : f32
    %21 = vector.broadcast %cst_13 : f32 to vector<32x512xf32>
    %22 = arith.maximumf %20, %21 : vector<32x512xf32>
    %c64 = arith.constant 64 : index
    %c32_14 = arith.constant 32 : index
    %23 = vector.load %arg2[%c64, %c32_14] : memref<152x33xf32, #tpu.memory_space<vmem>>, vector<24x1xf32>
    %c64_15 = arith.constant 64 : index
    %c0_16 = arith.constant 0 : index
    %24 = vector.load %arg2[%c64_15, %c0_16] : memref<152x33xf32, #tpu.memory_space<vmem>>, vector<24x32xf32>
    %cst_17 = arith.constant dense<0.000000e+00> : vector<24x512xf32>
    %25 = tpu.matmul %24, %22, %cst_17 {dimension_numbers = #tpu.dot_dimension_numbers<[1], [0], [0], [1], [0, 0, 1, 1], [], []>} : vector<24x32xf32>, vector<32x512xf32>, vector<24x512xf32> -> vector<24x512xf32>
    %26 = vector.broadcast %23 : vector<24x1xf32> to vector<24x512xf32>
    %27 = arith.addf %25, %26 : vector<24x512xf32>
    %cst_18 = arith.constant 0.000000e+00 : f32
    %28 = vector.broadcast %cst_18 : f32 to vector<24x512xf32>
    %29 = arith.maximumf %27, %28 : vector<24x512xf32>
    %c88 = arith.constant 88 : index
    %c32_19 = arith.constant 32 : index
    %30 = vector.load %arg2[%c88, %c32_19] : memref<152x33xf32, #tpu.memory_space<vmem>>, vector<32x1xf32>
    %c88_20 = arith.constant 88 : index
    %c0_21 = arith.constant 0 : index
    %31 = vector.load %arg2[%c88_20, %c0_21] : memref<152x33xf32, #tpu.memory_space<vmem>>, vector<32x24xf32>
    %c88_22 = arith.constant 88 : index
    %c24 = arith.constant 24 : index
    %32 = vector.load %arg2[%c88_22, %c24] : memref<152x33xf32, #tpu.memory_space<vmem>>, vector<32x8xf32>
    %cst_23 = arith.constant dense<0.000000e+00> : vector<32x512xf32>
    %33 = tpu.matmul %31, %29, %cst_23 {dimension_numbers = #tpu.dot_dimension_numbers<[1], [0], [0], [1], [0, 0, 1, 1], [], []>} : vector<32x24xf32>, vector<24x512xf32>, vector<32x512xf32> -> vector<32x512xf32>
    %cst_24 = arith.constant dense<0.000000e+00> : vector<32x512xf32>
    %34 = tpu.matmul %32, %8, %cst_24 {dimension_numbers = #tpu.dot_dimension_numbers<[1], [0], [0], [1], [0, 0, 1, 1], [], []>} : vector<32x8xf32>, vector<8x512xf32>, vector<32x512xf32> -> vector<32x512xf32>
    %35 = arith.addf %33, %34 : vector<32x512xf32>
    %36 = vector.broadcast %30 : vector<32x1xf32> to vector<32x512xf32>
    %37 = arith.addf %35, %36 : vector<32x512xf32>
    %cst_25 = arith.constant 0.000000e+00 : f32
    %38 = vector.broadcast %cst_25 : f32 to vector<32x512xf32>
    %39 = arith.maximumf %37, %38 : vector<32x512xf32>
    %c120 = arith.constant 120 : index
    %c0_26 = arith.constant 0 : index
    %40 = vector.load %arg2[%c120, %c0_26] : memref<152x33xf32, #tpu.memory_space<vmem>>, vector<32x1xf32>
    %c120_27 = arith.constant 120 : index
    %c32_28 = arith.constant 32 : index
    %41 = vector.load %arg2[%c120_27, %c32_28] : memref<152x33xf32, #tpu.memory_space<vmem>>, vector<1x1xf32>
    %42 = vector.broadcast %40 : vector<32x1xf32> to vector<32x512xf32>
    %43 = arith.mulf %42, %39 : vector<32x512xf32>
    %cst_29 = arith.constant dense<0.000000e+00> : vector<512xf32>
    %44 = vector.multi_reduction <add>, %43, %cst_29 [0] : vector<32x512xf32> to vector<512xf32>
    %45 = vector.shape_cast %44 : vector<512xf32> to vector<1x512xf32>
    %46 = vector.broadcast %41 : vector<1x1xf32> to vector<1x512xf32>
    %47 = arith.addf %45, %46 : vector<1x512xf32>
    %c0_30 = arith.constant 0 : index
    %c0_31 = arith.constant 0 : index
    %c0_32 = arith.constant 0 : index
    %48 = vector.load %arg3[%c0_30, %c0_31, %c0_32] : memref<1x1x512xf32, #tpu.memory_space<vmem>>, vector<1x1x512xf32>
    %49 = vector.shape_cast %48 : vector<1x1x512xf32> to vector<1x512xf32>
    %50 = vector.shape_cast %47 : vector<1x512xf32> to vector<1x1x512xf32>
    tpu.vector_store %arg3[%c0_30, %c0_31, %c0_32], %50 {strides = array<i32>} : memref<1x1x512xf32, #tpu.memory_space<vmem>>, vector<1x1x512xf32>,
    return
  }
  func.func @transform_0(%arg0: i32) -> (i32, i32) {
    %c0_i32 = arith.constant 0 : i32
    %c0_i32_0 = arith.constant 0 : i32
    return %arg0, %c0_i32 : i32, i32
  }
  func.func @transform_1(%arg0: i32) -> (i32, i32) {
    %c0_i32 = arith.constant 0 : i32
    %c0_i32_0 = arith.constant 0 : i32
    %c0_i32_1 = arith.constant 0 : i32
    return %c0_i32, %c0_i32_0 : i32, i32
  }
  func.func @transform_2(%arg0: i32) -> (i32, i32, i32) {
    %c0_i32 = arith.constant 0 : i32
    %c0_i32_0 = arith.constant 0 : i32
    %c0_i32_1 = arith.constant 0 : i32
    return %arg0, %c0_i32, %c0_i32_0 : i32, i32, i32
  }
}

</mosaic_0001>

<bundles_post_ra>
// kernel: tpu_custom_call.1
= control target key start
LH: loop header
LB: loop body
LE: loop exit
PB: predicated region body
PF: predicated region fallthrough
CT: control target
= control target key end

     0   :  { %7 = vsyncpa [#allocation3], 0  ;;  %s2064_s0 = inlined_call_operand.vmem [shape: f32[1024,8], index: 0, kind: input, shape index: {}]   ;;  %s2065_s1 = inlined_call_operand.vmem [shape: f32[152,33], index: 1, kind: input, shape index: {}]   ;;  %s2066_s2 = inlined_call_operand.hbm [shape: f32[2,1,512], index: 2, kind: output, shape index: {}]  }
   0x1   :  { %9 = vsyncpa [#allocation3 + $0x1], 0  ;;  %s1589_s9 = smov 0   ;;  %s1591_s10 = smov 0  }
   0x2   :  { %s1593_s11 = smov 0   ;;  %s1595_s12 = smov 0  }
   0x3 LB: > { %s1610_s13 = sadd.s32 4294967295, %s1569_s12   ;;  %s1299_s14 = sadd.s32 4294967294, %s1569_s12   ;;  %s1569_s12 = sphi %s1595_s12, %s2072_s12   ;;  %s1565_s11 = sphi %s1593_s11, %s2071_s11   ;;  %s1561_s10 = sphi %s1591_s10, %s2070_s10   ;;  %s1557_s9 = sphi %s1589_s9, %s2069_s9  }
   0x4   : > { %s1614_s15 = sadd.s32 1, %s1569_s12   ;;  %s69_s16 = sadd.s32 1, %s1565_s11 }
   0x5   : > { %s66_s17 = ssub.s32 %s1569_s12, %s1614_s15  ;;  %p79_p0 = scmp.ne.s32.totalorder %s1565_s11, %s1561_s10 }
   0x6   : > { %p67_p1 = scmp.eq.s32.totalorder %s66_s17, 0  ;;  %p80_p2 = scmp.eq.s32.totalorder %s1610_s13, 1 }
   0x7   : > { %p85_p3 = scmp.ne.s32.totalorder %s1561_s10, %s1557_s9  ;;  %p86_p4 = scmp.eq.s32.totalorder %s1299_s14, 1 }
   0x8   : > { %s1625_s18 = scalar_select %p67_p1, %s1565_s11, %s69_s16  }
   0x9   : > { %p1627_p5 = por %p80_p2, %p79_p0  ;;  %p1631_p6 = por %p86_p4, %p85_p3 }
   0xa   : > { %p1302_p7 = scmp.ge.s32.totalorder %s1569_s12, 1  ;;  %p116_p8 = scmp.lt.s32.totalorder %s1569_s12, 3 }
   0xc   : > { %p117_p9 = pnand %p1302_p7, %p116_p8 }
   0xd   : > { %s1304_s21 = sshll.u32 (!%p117_p9), %s1610_s13, 6  ;;  %s1572_s26 = smov (!%p117_p9), 104  }
   0xe   : > { %120 = sbr.rel (%p117_p9) target bundleno = 875 (0x36b), region = 28  ;;  %p139_p10 = scmp.lt.s32.totalorder (!%p117_p9), %s1304_s21, 127 }
   0xf   : > { %s135_s30 = sand.u32 (!%p117_p9), 1, %s1561_s10   ;;  %s1383_s3 = sshll.u32 (!%p117_p9), %s1610_s13, 2 }
  0x10   : > { %s1235_s6 = scalar_lea.hbm (!%p117_p9), %s2066_s2, %s1383_s3  ;;  %s1225_s14 = scalar_lea.sflag (!%p117_p9), [#allocation3], %s135_s30 }
  0x11   : > { %s1239_s13 = sshll.u32 (!%p117_p9), %s1235_s6, 4  ;;  %s1527_s23 = scalar_lea.hbm (!%p117_p9), %s2066_s2, 8  ;;  %s1240_s13 = int_to_ptr.hbm [resolvable:$true] %s1239_s13 }
  0x12   : > { %s1521_s16 = sshra.s32 (!%p117_p9), %s1240_s13, 4  ;;  %s1522_s16 = int_to_ptr.hbm [resolvable:$true] %s1521_s16 }
  0x13   : > { %s2074_s21 = smov (!%p139_p10, %s1304_s21), 127  ;;  %v1676_v44 = vld [vmem:[%s2065_s1 + $0x18] sm:$0xff]  ;;  %v1571_v47 = vmov 32   ;;  %v1687_v52 = vld [vmem:[%s2065_s1 + $0x10] sm:$0xff]  ;;  %v1697_v59 = vld [vmem:[%s2065_s1 + $0x8] sm:$0xff]  ;;  %vm360_vm0 = vcmask 64512   ;;  %p1528_p0 = scmp.lt.s32.totalorder %s1522_s16, %s2066_s2 }
  0x14   : > { %s1305_s22 = sshll.u32 %s2074_s21, 3  ;;  %1502 = vset.pattern.permute.xlu2 %v1571_v47  ;;  %vm525_vm1 = vcmask 261120   ;;  %vm946_vm2 = vcmask 195584   ;;  %vm1212_vm3 = vcmask 1040384   ;;  %vm1214_vm4 = vcmask 1042434   ;;  %s1523_s17 = scalar_lea.hbm %s1522_s16, 4 }
  0x15   : > { %s1641_s25 = scalar_lea.vmem %s2064_s0, %s1305_s22  ;;  %357 = vperm.xlu2 %1502, %v1676_v44   ;;  %vm1216_vm5 = vcmask 1041408   ;;  %p1524_p11 = scmp.ne.s32.totalorder %s1522_s16, %s1523_s17 }
  0x16   : > { %v240_v0 = vld [vmem:[%s1641_s25 + $0x100] sm:$0xff]  ;;  %v241_v6 = vld [vmem:[%s1641_s25 + $0x108] sm:$0xff]  ;;  %v242_v12 = vld [vmem:[%s1641_s25 + $0x110] sm:$0xff]  ;;  %p1529_p1 = scmp.lt.s32.totalorder %s1527_s23, %s1523_s17 }
  0x17   : > { %v288_v1 = vld [vmem:[%s1641_s25 + $0x180] sm:$0xff]  ;;  %v289_v7 = vld [vmem:[%s1641_s25 + $0x188] sm:$0xff]  ;;  %v290_v13 = vld [vmem:[%s1641_s25 + $0x190] sm:$0xff]  ;;  %p1525_p12 = pnand %p1524_p11, %p1627_p5 }
  0x18   : > { %v144_v2 = vld [vmem:[%s1641_s25] sm:$0xff]  ;;  %v1428_v3 = vpack.i.bf16 %v288_v1, %v240_v0  ;;  %v145_v8 = vld [vmem:[%s1641_s25 + $0x8] sm:$0xff]  ;;  %v1430_v10 = vpack.i.bf16 %v289_v7, %v241_v6  ;;  %v146_v14 = vld [vmem:[%s1641_s25 + $0x10] sm:$0xff]  ;;  %v1432_v16 = vpack.i.bf16 %v290_v13, %v242_v12  ;;  %p1530_p2 = por %p1529_p1, %p1528_p0 }
  0x19   : > { %v192_v4 = vld [vmem:[%s1641_s25 + $0x80] sm:$0xff]  ;;  %v193_v9 = vld [vmem:[%s1641_s25 + $0x88] sm:$0xff]  ;;  %v194_v15 = vld [vmem:[%s1641_s25 + $0x90] sm:$0xff]  ;;  %p1526_p13 = pneg %p1525_p12 }
  0x1a   : > { %v1465_v5 = vpack.i.bf16 %v144_v2, %v192_v4  ;;  %1429 = vxpose.xlu0.b32.start [1/16] (narrow) %v1428_v3, 8  ;;  %v1467_v11 = vpack.i.bf16 %v145_v8, %v193_v9  ;;  %v1469_v17 = vpack.i.bf16 %v146_v14, %v194_v15  ;;  %v243_v18 = vld [vmem:[%s1641_s25 + $0x118] sm:$0xff]  ;;  %v244_v24 = vld [vmem:[%s1641_s25 + $0x120] sm:$0xff]  ;;  %v245_v30 = vld [vmem:[%s1641_s25 + $0x128] sm:$0xff] }
  0x1b   : > { %v291_v19 = vld [vmem:[%s1641_s25 + $0x198] sm:$0xff]  ;;  %v292_v25 = vld [vmem:[%s1641_s25 + $0x1a0] sm:$0xff]  ;;  %v293_v31 = vld [vmem:[%s1641_s25 + $0x1a8] sm:$0xff]  ;;  %p1531_p3 = pnand %p1530_p2, %p1526_p13 }
  0x1c   : > { %1466 = vxpose.xlu1.b32.start [1/16] (narrow) %v1465_v5, 8  ;;  %v147_v20 = vld [vmem:[%s1641_s25 + $0x18] sm:$0xff]  ;;  %v1434_v22 = vpack.i.bf16 %v291_v19, %v243_v18  ;;  %v148_v26 = vld [vmem:[%s1641_s25 + $0x20] sm:$0xff]  ;;  %v1436_v28 = vpack.i.bf16 %v292_v25, %v244_v24  ;;  %v149_v32 = vld [vmem:[%s1641_s25 + $0x28] sm:$0xff]  ;;  %v1438_v34 = vpack.i.bf16 %v293_v31, %v245_v30 }
  0x1d   : > { %v195_v21 = vld [vmem:[%s1641_s25 + $0x98] sm:$0xff]  ;;  %v196_v27 = vld [vmem:[%s1641_s25 + $0xa0] sm:$0xff]  ;;  %v197_v33 = vld [vmem:[%s1641_s25 + $0xa8] sm:$0xff]  ;;  %352 = vperm.xlu2 %1502, %v1687_v52  }
  0x1e   : > { %v1471_v23 = vpack.i.bf16 %v147_v20, %v195_v21  ;;  %v1473_v29 = vpack.i.bf16 %v148_v26, %v196_v27  ;;  %v1475_v35 = vpack.i.bf16 %v149_v32, %v197_v33  ;;  %v246_v36 = vld [vmem:[%s1641_s25 + $0x130] sm:$0xff]  ;;  %v247_v42 = vld [vmem:[%s1641_s25 + $0x138] sm:$0xff]  ;;  %v248_v50 = vld [vmem:[%s1641_s25 + $0x140] sm:$0xff] }
  0x1f   : > { %v294_v37 = vld [vmem:[%s1641_s25 + $0x1b0] sm:$0xff]  ;;  %v295_v43 = vld [vmem:[%s1641_s25 + $0x1b8] sm:$0xff]  ;;  %v296_v51 = vld [vmem:[%s1641_s25 + $0x1c0] sm:$0xff] }
  0x20   : > { %v150_v38 = vld [vmem:[%s1641_s25 + $0x30] sm:$0xff]  ;;  %v1440_v40 = vpack.i.bf16 %v294_v37, %v246_v36  ;;  %v151_v45 = vld [vmem:[%s1641_s25 + $0x38] sm:$0xff]  ;;  %v1442_v48 = vpack.i.bf16 %v295_v43, %v247_v42  ;;  %v152_v53 = vld [vmem:[%s1641_s25 + $0x40] sm:$0xff]  ;;  %v1444_v55 = vpack.i.bf16 %v296_v51, %v248_v50 }
  0x21   : > { %v198_v39 = vld [vmem:[%s1641_s25 + $0xb0] sm:$0xff]  ;;  %v199_v46 = vld [vmem:[%s1641_s25 + $0xb8] sm:$0xff]  ;;  %v200_v54 = vld [vmem:[%s1641_s25 + $0xc0] sm:$0xff] }
  0x22   : > { %1431 = vxpose.xlu0.b32.cont [2/16] (narrow) %v1430_v10, 8  ;;  %v1477_v41 = vpack.i.bf16 %v150_v38, %v198_v39  ;;  %v1479_v49 = vpack.i.bf16 %v151_v45, %v199_v46  ;;  %v1481_v56 = vpack.i.bf16 %v152_v53, %v200_v54  ;;  %v249_v57 = vld [vmem:[%s1641_s25 + $0x148] sm:$0xff]  ;;  %v250_v0 = vld [vmem:[%s1641_s25 + $0x150] sm:$0xff]  ;;  %v1707_v2 = vld [vmem:[%s2065_s1] sm:$0xff] }
  0x23   : > { %v297_v58 = vld [vmem:[%s1641_s25 + $0x1c8] sm:$0xff]  ;;  %v298_v1 = vld [vmem:[%s1641_s25 + $0x1d0] sm:$0xff]  ;;  %v251_v7 = vld [vmem:[%s1641_s25 + $0x158] sm:$0xff] }
  0x24   : > { %1468 = vxpose.xlu1.b32.cont [2/16] (narrow) %v1467_v11, 8  ;;  %v153_v60 = vld [vmem:[%s1641_s25 + $0x48] sm:$0xff]  ;;  %v1446_v62 = vpack.i.bf16 %v297_v58, %v249_v57  ;;  %v154_v3 = vld [vmem:[%s1641_s25 + $0x50] sm:$0xff]  ;;  %v1448_v5 = vpack.i.bf16 %v298_v1, %v250_v0  ;;  %v299_v8 = vld [vmem:[%s1641_s25 + $0x1d8] sm:$0xff] }
  0x25   : > { %v201_v61 = vld [vmem:[%s1641_s25 + $0xc8] sm:$0xff]  ;;  %347 = vperm.xlu2 %1502, %v1697_v59   ;;  %v202_v4 = vld [vmem:[%s1641_s25 + $0xd0] sm:$0xff]  ;;  %v1717_v9 = vld [vmem:[%s2065_s1 + $0x38] sm:$0xff]  ;;  %v1450_v12 = vpack.i.bf16 %v299_v8, %v251_v7 }
  0x26   : > { %v1483_v63 = vpack.i.bf16 %v153_v60, %v201_v61  ;;  %v1485_v6 = vpack.i.bf16 %v154_v3, %v202_v4  ;;  %v155_v10 = vld [vmem:[%s1641_s25 + $0x58] sm:$0xff]  ;;  %v252_v14 = vld [vmem:[%s1641_s25 + $0x160] sm:$0xff]  ;;  %v1735_v21 = vld [vmem:[%s2065_s1 + $0x28] sm:$0xff] }
  0x27   : > { %v203_v11 = vld [vmem:[%s1641_s25 + $0xd8] sm:$0xff]  ;;  %v300_v15 = vld [vmem:[%s1641_s25 + $0x1e0] sm:$0xff]  ;;  %v157_v24 = vld [vmem:[%s1641_s25 + $0x68] sm:$0xff] }
  0x28   : > { %v1487_v13 = vpack.i.bf16 %v155_v10, %v203_v11  ;;  %v204_v18 = vld [vmem:[%s1641_s25 + $0xe0] sm:$0xff]  ;;  %v1452_v19 = vpack.i.bf16 %v300_v15, %v252_v14  ;;  %v205_v25 = vld [vmem:[%s1641_s25 + $0xe8] sm:$0xff]  ;;  %v302_v30 = vld [vmem:[%s1641_s25 + $0x1f0] sm:$0xff] }
  0x29   : > { %v1491_v27 = vpack.i.bf16 %v157_v24, %v205_v25  ;;  %v158_v31 = vld [vmem:[%s1641_s25 + $0x70] sm:$0xff]  ;;  %v255_v36 = vld [vmem:[%s1641_s25 + $0x178] sm:$0xff]  ;;  %v1765_v42 = vld [vmem:[%s2065_s1 + $0x60] sm:$0xff] }
  0x2a   : > { %1433 = vxpose.xlu0.b32.cont [3/16] (narrow) %v1432_v16, 8  ;;  %v1727_v16 = vld [vmem:[%s2065_s1 + $0x30] sm:$0xff]  ;;  %v303_v37 = vld [vmem:[%s1641_s25 + $0x1f8] sm:$0xff]  ;;  %v1771_v43 = vld [vmem:[%s2065_s1 + $0x68] sm:$0xff] }
  0x2b   : > { %v206_v32 = vld [vmem:[%s1641_s25 + $0xf0] sm:$0xff]  ;;  %v159_v38 = vld [vmem:[%s1641_s25 + $0x78] sm:$0xff] }
  0x2c   : > { %1470 = vxpose.xlu1.b32.cont [3/16] (narrow) %v1469_v17, 8  ;;  %v156_v17 = vld [vmem:[%s1641_s25 + $0x60] sm:$0xff]  ;;  %v207_v39 = vld [vmem:[%s1641_s25 + $0xf8] sm:$0xff]  ;;  %v1777_v45 = vld [vmem:[%s2065_s1 + $0x50] sm:$0xff] }
  0x2d   : > { %342 = vperm.xlu2 %1502, %v1707_v2   ;;  %v1489_v20 = vpack.i.bf16 %v156_v17, %v204_v18  ;;  %v1783_v46 = vld [vmem:[%s2065_s1 + $0x70] sm:$0xff] }
  0x32   : > { %1435 = vxpose.xlu0.b32.cont [4/16] (narrow) %v1434_v22, 8  ;;  %v253_v22 = vld [vmem:[%s1641_s25 + $0x168] sm:$0xff] }
  0x34   : > { %1472 = vxpose.xlu1.b32.cont [4/16] (narrow) %v1471_v23, 8  ;;  %v301_v23 = vld [vmem:[%s1641_s25 + $0x1e8] sm:$0xff] }
  0x35   : > { %522 = vperm.xlu2 %1502, %v1717_v9   ;;  %v1454_v26 = vpack.i.bf16 %v301_v23, %v253_v22 }
  0x3a   : > { %1437 = vxpose.xlu0.b32.cont [5/16] (narrow) %v1436_v28, 8  ;;  %v1745_v28 = vld [vmem:[%s2065_s1 + $0x20] sm:$0xff] }
  0x3c   : > { %1474 = vxpose.xlu1.b32.cont [5/16] (narrow) %v1473_v29, 8  ;;  %v254_v29 = vld [vmem:[%s1641_s25 + $0x170] sm:$0xff]  ;;  %s1303_s25 = sshll.u32 %s135_s30, 2 }
  0x3d   : > { %517 = vperm.xlu2 %1502, %v1727_v16   ;;  %v1456_v33 = vpack.i.bf16 %v302_v30, %v254_v29  ;;  %s137_s7 = scalar_lea.vmem [#allocation2], %s1303_s25 }
  0x3e   : > { %s1237_s8 = sshll.u32 %s137_s7, 4  ;;  %s1238_s8 = int_to_ptr.vmem [resolvable:$true] %s1237_s8 }
  0x42   : > { %1439 = vxpose.xlu0.b32.cont [6/16] (narrow) %v1438_v34, 8  ;;  %v1493_v34 = vpack.i.bf16 %v158_v31, %v206_v32 }
  0x44   : > { %1476 = vxpose.xlu1.b32.cont [6/16] (narrow) %v1475_v35, 8  ;;  %v1755_v35 = vld [vmem:[%s2065_s1 + $0x58] sm:$0xff] }
  0x45   : > { %512 = vperm.xlu2 %1502, %v1735_v21  }
  0x4a   : > { %1441 = vxpose.xlu0.b32.cont [7/16] (narrow) %v1440_v40, 8  ;;  %v1458_v40 = vpack.i.bf16 %v303_v37, %v255_v36 }
  0x4c   : > { %1478 = vxpose.xlu1.b32.cont [7/16] (narrow) %v1477_v41, 8  ;;  %v1495_v41 = vpack.i.bf16 %v159_v38, %v207_v39 }
  0x4d   : > { %507 = vperm.xlu2 %1502, %v1745_v28  }
  0x52   : > { %1443 = vxpose.xlu0.b32.cont [8/16] (narrow) %v1442_v48, 8  ;;  %v1789_v48 = vld [vmem:[%s2065_s1 + $0x48] sm:$0xff] }
  0x54   : > { %1480 = vxpose.xlu1.b32.cont [8/16] (narrow) %v1479_v49, 8 }
  0x55   : > { %814 = vrot.lane.b32.xlu2 %v1755_v35, %s1572_s26 }
  0x5a   : > { %1445 = vxpose.xlu0.b32.cont [9/16] (narrow) %v1444_v55, 8 }
  0x5c   : > { %1482 = vxpose.xlu1.b32.cont [9/16] (narrow) %v1481_v56, 8  ;;  %v1811_v56 = vld [vmem:[%s2065_s1 + $0x40] sm:$0xff] }
  0x5d   : > { %816 = vrot.lane.b32.xlu2 %v1765_v42, %s1572_s26 }
  0x62   : > { %1447 = vxpose.xlu0.b32.cont [10/16] (narrow) %v1446_v62, 8 }
  0x64   : > { %1484 = vxpose.xlu1.b32.cont [10/16] (narrow) %v1483_v63, 8 }
  0x65   : > { %818 = vrot.lane.b32.xlu2 %v1771_v43, %s1572_s26 }
  0x6a   : > { %1449 = vxpose.xlu0.b32.cont [11/16] (narrow) %v1448_v5, 8 }
  0x6c   : > { %1486 = vxpose.xlu1.b32.cont [11/16] (narrow) %v1485_v6, 8 }
  0x6d   : > { %681 = vperm.xlu2 %1502, %v1777_v45  }
  0x72   : > { %1451 = vxpose.xlu0.b32.cont [12/16] (narrow) %v1450_v12, 8 }
  0x74   : > { %1488 = vxpose.xlu1.b32.cont [12/16] (narrow) %v1487_v13, 8 }
  0x75   : > { %820 = vrot.lane.b32.xlu2 %v1783_v46, %s1572_s26 }
  0x7a   : > { %1453 = vxpose.xlu0.b32.cont [13/16] (narrow) %v1452_v19, 8 }
  0x7c   : > { %1490 = vxpose.xlu1.b32.cont [13/16] (narrow) %v1489_v20, 8 }
  0x7d   : > { %676 = vperm.xlu2 %1502, %v1789_v48  }
  0x82   : > { %1455 = vxpose.xlu0.b32.cont [14/16] (narrow) %v1454_v26, 8 }
  0x84   : > { %1492 = vxpose.xlu1.b32.cont [14/16] (narrow) %v1491_v27, 8 }
  0x85   : > { %671 = vperm.xlu2 %1502, %v1811_v56  }
  0x8a   : > { %1457 = vxpose.xlu0.b32.cont [15/16] (narrow) %v1456_v33, 8 }
  0x8c   : > { %1494 = vxpose.xlu1.b32.cont [15/16] (narrow) %v1493_v34, 8 }
  0x8d   : > { %1072 = vperm.xlu2 %1502, %v1755_v35  }
  0x92   : > { %1459 = vxpose.xlu0.b32.end [16/16] (narrow) %v1458_v40, 8 }
  0x94   : > { %1496 = vxpose.xlu1.b32.end [16/16] (narrow) %v1495_v41, 8 }
  0x95   : > { %1084 = vperm.xlu2 %1502, %v1783_v46  }
  0xbe   : > { %v1792_v49 = vpop.trf.xlu0 }
  0xbf   : > { %v1461_v51 = vunpack.i.l.bf16 %v1792_v49  ;;  %v1464_v53 = vunpack.i.h.bf16 %v1792_v49 }
  0xc0   : > { %v1794_v50 = vpop.trf.xlu1 }
  0xc1   : > { %v1501_v54 = vunpack.i.h.bf16 %v1794_v50  ;;  %v1498_v55 = vunpack.i.l.bf16 %v1794_v50  ;;  %442 = vmatpush.msra.mxu2 %v1461_v51  ;;  %471 = vmatpush.msra.mxu3 %v1464_v53 }
  0xc2   : > { %1314 = vmatmul.msk.f32.vlgmr.msra.gmra.mxu2 %vm360_vm0, %v1707_v2  ;;  %1318 = vmatmul.msk.f32.vlgmr.msra.gmra.mxu3 %vm360_vm0, %v1707_v2 }
  0xc3   : > { %384 = vmatpush.msra.mxu0 %v1501_v54  ;;  %413 = vmatpush.msra.mxu1 %v1498_v55 }
  0xc4   : > { %1306 = vmatmul.msk.f32.vlgmr.msra.gmra.mxu0 %vm360_vm0, %v1707_v2  ;;  %1310 = vmatmul.msk.f32.vlgmr.msra.gmra.mxu1 %vm360_vm0, %v1707_v2 }
  0xca   : > { %1315 = vmatmul.msk.f32.gmra.mxu2 %vm360_vm0, %v1697_v59  ;;  %1319 = vmatmul.msk.f32.gmra.mxu3 %vm360_vm0, %v1697_v59 }
  0xcc   : > { %1307 = vmatmul.msk.f32.gmra.mxu0 %vm360_vm0, %v1697_v59  ;;  %1311 = vmatmul.msk.f32.gmra.mxu1 %vm360_vm0, %v1697_v59 }
  0xd2   : > { %1316 = vmatmul.msk.f32.gmra.mxu2 %vm360_vm0, %v1687_v52  ;;  %1320 = vmatmul.msk.f32.gmra.mxu3 %vm360_vm0, %v1687_v52 }
  0xd4   : > { %1308 = vmatmul.msk.f32.gmra.mxu0 %vm360_vm0, %v1687_v52  ;;  %1312 = vmatmul.msk.f32.gmra.mxu1 %vm360_vm0, %v1687_v52  ;;  %v358_v52 = vpop.permute.xlu2 %357 }
  0xda   : > { %1317 = vmatmul.msk.f32.gmra.mxu2 %vm360_vm0, %v1676_v44  ;;  %1321 = vmatmul.msk.f32.gmra.mxu3 %vm360_vm0, %v1676_v44 }
  0xdc   : > { %1309 = vmatmul.msk.f32.gmra.mxu0 %vm360_vm0, %v1676_v44  ;;  %1313 = vmatmul.msk.f32.gmra.mxu1 %vm360_vm0, %v1676_v44  ;;  %v353_v59 = vpop.permute.xlu2 %352 }
  0xe4   : > { %v348_v3 = vpop.permute.xlu2 %347 }
  0xe7   : > { %1504 = vset.pattern.permute.xlu1 %v1571_v47 }
  0xec   : > { %v343_v18 = vpop.permute.xlu2 %342 }
  0xee   : > { %1080 = vperm.xlu1 %1504, %v1771_v43  }
  0xf9   : > { %1503 = vset.pattern.permute.xlu0 %v1571_v47 }
 0x100   : > { %1076 = vperm.xlu0 %1503, %v1765_v42  }
 0x141   : > { %v386_v57 = vpop.f32.mrf.mxu0  ;;  %v415_v58 = vpop.f32.mrf.mxu1 }
 0x142   : > { %v387_v19 = vadd.f32 %v386_v57, %v343_v18  ;;  %v416_v20 = vadd.f32 %v415_v58, %v343_v18 }
 0x144   : > { %v485_v33 = vmax.f32 %v387_v19, 0.0  ;;  %v486_v34 = vmax.f32 %v416_v20, 0.0 }
 0x145   : > { %v444_v60 = vpop.f32.mrf.mxu2  ;;  %v473_v61 = vpop.f32.mrf.mxu3 }
 0x146   : > { %v445_v40 = vadd.f32 %v444_v60, %v343_v18  ;;  %v474_v41 = vadd.f32 %v473_v61, %v343_v18 }
 0x149   : > { %v389_v62 = vpop.f32.mrf.mxu0  ;;  %v418_v63 = vpop.f32.mrf.mxu1 }
 0x14a   : > { %v390_v13 = vadd.f32 %v389_v62, %v348_v3  ;;  %v419_v14 = vadd.f32 %v418_v63, %v348_v3  ;;  %v487_v62 = vmax.f32 %v445_v40, 0.0  ;;  %v488_v63 = vmax.f32 %v474_v41, 0.0 }
 0x14c   : > { %v489_v24 = vmax.f32 %v390_v13, 0.0  ;;  %v490_v25 = vmax.f32 %v419_v14, 0.0 }
 0x14d   : > { %v447_v0 = vpop.f32.mrf.mxu2  ;;  %v476_v1 = vpop.f32.mrf.mxu3 }
 0x14e   : > { %v448_v36 = vadd.f32 %v447_v0, %v348_v3  ;;  %v477_v37 = vadd.f32 %v476_v1, %v348_v3 }
 0x151   : > { %v392_v2 = vpop.f32.mrf.mxu0  ;;  %v421_v44 = vpop.f32.mrf.mxu1 }
 0x152   : > { %v393_v8 = vadd.f32 %v392_v2, %v353_v59  ;;  %v422_v10 = vadd.f32 %v421_v44, %v353_v59 }
 0x154   : > { %v493_v22 = vmax.f32 %v393_v8, 0.0  ;;  %v494_v23 = vmax.f32 %v422_v10, 0.0 }
 0x155   : > { %v450_v4 = vpop.f32.mrf.mxu2  ;;  %v479_v5 = vpop.f32.mrf.mxu3 }
 0x156   : > { %v451_v29 = vadd.f32 %v450_v4, %v353_v59  ;;  %v480_v30 = vadd.f32 %v479_v5, %v353_v59  ;;  %v492_v59 = vmax.f32 %v477_v37, 0.0 }
 0x158   : > { %v495_v57 = vmax.f32 %v451_v29, 0.0  ;;  %v496_v58 = vmax.f32 %v480_v30, 0.0 }
 0x159   : > { %v395_v6 = vpop.f32.mrf.mxu0  ;;  %v424_v7 = vpop.f32.mrf.mxu1 }
 0x15a   : > { %v396_v11 = vadd.f32 %v395_v6, %v358_v52  ;;  %v425_v12 = vadd.f32 %v424_v7, %v358_v52 }
 0x15c   : > { %v497_v15 = vmax.f32 %v396_v11, 0.0  ;;  %v498_v17 = vmax.f32 %v425_v12, 0.0 }
 0x15d   : > { %v453_v26 = vpop.f32.mrf.mxu2  ;;  %v482_v27 = vpop.f32.mrf.mxu3 }
 0x15e   : > { %546 = vmatpush.msrb.mxu0 %v497_v15  ;;  %575 = vmatpush.msrb.mxu1 %v498_v17  ;;  %v454_v31 = vadd.f32 %v453_v26, %v358_v52  ;;  %v483_v32 = vadd.f32 %v482_v27, %v358_v52  ;;  %v491_v52 = vmax.f32 %v448_v36, 0.0 }
 0x160   : > { %547 = vmatpush.msrb.mxu0 %v493_v22  ;;  %576 = vmatpush.msrb.mxu1 %v494_v23  ;;  %v499_v38 = vmax.f32 %v454_v31, 0.0  ;;  %v500_v39 = vmax.f32 %v483_v32, 0.0 }
 0x162   : > { %548 = vmatpush.msrb.mxu0 %v489_v24  ;;  %577 = vmatpush.msrb.mxu1 %v490_v25 }
 0x163   : > { %604 = vmatpush.msrb.mxu2 %v499_v38  ;;  %633 = vmatpush.msrb.mxu3 %v500_v39 }
 0x164   : > { %549 = vmatpush.msrb.mxu0 %v485_v33  ;;  %578 = vmatpush.msrb.mxu1 %v486_v34 }
 0x165   : > { %1322 = vmatmul.msk.f32.vlgmr.msrb.gmra.mxu0 %vm525_vm1, %v1745_v28  ;;  %1326 = vmatmul.msk.f32.vlgmr.msrb.gmra.mxu1 %vm525_vm1, %v1745_v28 }
 0x166   : > { %605 = vmatpush.msrb.mxu2 %v495_v57  ;;  %634 = vmatpush.msrb.mxu3 %v496_v58 }
 0x168   : > { %606 = vmatpush.msrb.mxu2 %v491_v52  ;;  %635 = vmatpush.msrb.mxu3 %v492_v59 }
 0x16a   : > { %607 = vmatpush.msrb.mxu2 %v487_v62  ;;  %636 = vmatpush.msrb.mxu3 %v488_v63 }
 0x16b   : > { %1330 = vmatmul.msk.f32.vlgmr.msrb.gmra.mxu2 %vm525_vm1, %v1745_v28  ;;  %1334 = vmatmul.msk.f32.vlgmr.msrb.gmra.mxu3 %vm525_vm1, %v1745_v28 }
 0x16d   : > { %1323 = vmatmul.msk.f32.gmra.mxu0 %vm525_vm1, %v1735_v21  ;;  %1327 = vmatmul.msk.f32.gmra.mxu1 %vm525_vm1, %v1735_v21 }
 0x173   : > { %1331 = vmatmul.msk.f32.gmra.mxu2 %vm525_vm1, %v1735_v21  ;;  %1335 = vmatmul.msk.f32.gmra.mxu3 %vm525_vm1, %v1735_v21  ;;  %v523_v21 = vpop.permute.xlu2 %522 }
 0x175   : > { %1324 = vmatmul.msk.f32.gmra.mxu0 %vm525_vm1, %v1727_v16  ;;  %1328 = vmatmul.msk.f32.gmra.mxu1 %vm525_vm1, %v1727_v16 }
 0x17b   : > { %1332 = vmatmul.msk.f32.gmra.mxu2 %vm525_vm1, %v1727_v16  ;;  %1336 = vmatmul.msk.f32.gmra.mxu3 %vm525_vm1, %v1727_v16  ;;  %v518_v61 = vpop.permute.xlu2 %517 }
 0x17d   : > { %1325 = vmatmul.msk.f32.gmra.mxu0 %vm525_vm1, %v1717_v9  ;;  %1329 = vmatmul.msk.f32.gmra.mxu1 %vm525_vm1, %v1717_v9 }
 0x183   : > { %1333 = vmatmul.msk.f32.gmra.mxu2 %vm525_vm1, %v1717_v9  ;;  %1337 = vmatmul.msk.f32.gmra.mxu3 %vm525_vm1, %v1717_v9  ;;  %v513_v4 = vpop.permute.xlu2 %512 }
 0x18b   : > { %v508_v9 = vpop.permute.xlu2 %507 }
 0x193   : > { %v815_v62 = vpop.permute.xlu2 %814 }
 0x1e2   : > { %v551_v28 = vpop.f32.mrf.mxu0  ;;  %v580_v60 = vpop.f32.mrf.mxu1 }
 0x1e3   : > { %v552_v22 = vadd.f32 %v551_v28, %v508_v9  ;;  %v581_v23 = vadd.f32 %v580_v60, %v508_v9 }
 0x1e5   : > { %v650_v29 = vmax.f32 %v552_v22, 0.0  ;;  %v651_v30 = vmax.f32 %v581_v23, 0.0 }
 0x1ea   : > { %v554_v0 = vpop.f32.mrf.mxu0  ;;  %v583_v1 = vpop.f32.mrf.mxu1 }
 0x1eb   : > { %v555_v14 = vadd.f32 %v554_v0, %v513_v4  ;;  %v584_v15 = vadd.f32 %v583_v1, %v513_v4 }
 0x1ed   : > { %v654_v26 = vmax.f32 %v555_v14, 0.0  ;;  %v655_v27 = vmax.f32 %v584_v15, 0.0 }
 0x1ee   : > { %v609_v2 = vpop.f32.mrf.mxu2  ;;  %v638_v16 = vpop.f32.mrf.mxu3 }
 0x1ef   : > { %v610_v57 = vadd.f32 %v609_v2, %v508_v9  ;;  %v639_v58 = vadd.f32 %v638_v16, %v508_v9 }
 0x1f1   : > { %v652_v50 = vmax.f32 %v610_v57, 0.0 }
 0x1f2   : > { %v557_v44 = vpop.f32.mrf.mxu0  ;;  %v586_v3 = vpop.f32.mrf.mxu1 }
 0x1f3   : > { %v558_v10 = vadd.f32 %v557_v44, %v518_v61  ;;  %v587_v11 = vadd.f32 %v586_v3, %v518_v61 }
 0x1f5   : > { %v658_v24 = vmax.f32 %v558_v10, 0.0  ;;  %v659_v25 = vmax.f32 %v587_v11, 0.0 }
 0x1f6   : > { %v612_v5 = vpop.f32.mrf.mxu2  ;;  %v641_v6 = vpop.f32.mrf.mxu3 }
 0x1f7   : > { %v613_v38 = vadd.f32 %v612_v5, %v513_v4  ;;  %v642_v39 = vadd.f32 %v641_v6, %v513_v4 }
 0x1f9   : > { %v656_v63 = vmax.f32 %v613_v38, 0.0  ;;  %v657_v28 = vmax.f32 %v642_v39, 0.0  ;;  %v1122_v38 = vld [vmem:[%s2065_s1 + $0x90] sm:$0xff] }
 0x1fa   : > { %v560_v7 = vpop.f32.mrf.mxu0  ;;  %v589_v8 = vpop.f32.mrf.mxu1 }
 0x1fb   : > { %v561_v12 = vadd.f32 %v560_v7, %v523_v21  ;;  %v590_v13 = vadd.f32 %v589_v8, %v523_v21 }
 0x1fd   : > { %v662_v17 = vmax.f32 %v561_v12, 0.0  ;;  %v663_v18 = vmax.f32 %v590_v13, 0.0 }
 0x1fe   : > { %v615_v19 = vpop.f32.mrf.mxu2  ;;  %v644_v20 = vpop.f32.mrf.mxu3 }
 0x1ff   : > { %702 = vmatpush.msra.mxu0 %v662_v17  ;;  %728 = vmatpush.msra.mxu1 %v663_v18  ;;  %v616_v31 = vadd.f32 %v615_v19, %v518_v61  ;;  %v645_v34 = vadd.f32 %v644_v20, %v518_v61  ;;  %v1119_v17 = vld [vmem:[%s2065_s1 + $0x78] sm:$0xff]  ;;  %v1573_v18 = vmov 0  }
 0x200   : > { %1505 = vset.pattern.permute.xlu2 %v1573_v18 }
 0x201   : > { %703 = vmatpush.msra.mxu0 %v658_v24  ;;  %729 = vmatpush.msra.mxu1 %v659_v25  ;;  %v660_v52 = vmax.f32 %v616_v31, 0.0  ;;  %v661_v59 = vmax.f32 %v645_v34, 0.0 }
 0x202   : > { %1126 = vperm.xlu2 %1505, %v1119_v17  }
 0x203   : > { %704 = vmatpush.msra.mxu0 %v654_v26  ;;  %730 = vmatpush.msra.mxu1 %v655_v27  ;;  %v1120_v26 = vld [vmem:[%s2065_s1 + $0x80] sm:$0xff] }
 0x205   : > { %705 = vmatpush.msra.mxu0 %v650_v29  ;;  %731 = vmatpush.msra.mxu1 %v651_v30 }
 0x206   : > { %v618_v32 = vpop.f32.mrf.mxu2  ;;  %v647_v33 = vpop.f32.mrf.mxu3  ;;  %1338 = vmatmul.msk.f32.vlgmr.msra.gmra.mxu0 %vm525_vm1, %v1811_v56  ;;  %1341 = vmatmul.msk.f32.vlgmr.msra.gmra.mxu1 %vm525_vm1, %v1811_v56 }
 0x207   : > { %v619_v36 = vadd.f32 %v618_v32, %v523_v21  ;;  %v648_v37 = vadd.f32 %v647_v33, %v523_v21  ;;  %845 = vmatpush.msrb.mxu0 %v1501_v54  ;;  %874 = vmatpush.msrb.mxu1 %v1498_v55  ;;  %v653_v54 = vmax.f32 %v639_v58, 0.0  ;;  %v817_v55 = vpop.permute.xlu2 %816 }
 0x209   : > { %v664_v40 = vmax.f32 %v619_v36, 0.0  ;;  %v665_v41 = vmax.f32 %v648_v37, 0.0  ;;  %v1121_v37 = vld [vmem:[%s2065_s1 + $0x88] sm:$0xff] }
 0x20a   : > { %1131 = vperm.xlu2 %1505, %v1120_v26  }
 0x20b   : > { %754 = vmatpush.msra.mxu2 %v664_v40  ;;  %780 = vmatpush.msra.mxu3 %v665_v41 }
 0x20d   : > { %755 = vmatpush.msra.mxu2 %v660_v52  ;;  %781 = vmatpush.msra.mxu3 %v661_v59 }
 0x20e   : > { %1339 = vmatmul.msk.f32.gmra.mxu0 %vm525_vm1, %v1789_v48  ;;  %1342 = vmatmul.msk.f32.gmra.mxu1 %vm525_vm1, %v1789_v48 }
 0x20f   : > { %756 = vmatpush.msra.mxu2 %v656_v63  ;;  %782 = vmatpush.msra.mxu3 %v657_v28 }
 0x211   : > { %757 = vmatpush.msra.mxu2 %v652_v50  ;;  %783 = vmatpush.msra.mxu3 %v653_v54 }
 0x212   : > { %1344 = vmatmul.msk.f32.vlgmr.msra.gmra.mxu2 %vm525_vm1, %v1811_v56  ;;  %1347 = vmatmul.msk.f32.vlgmr.msra.gmra.mxu3 %vm525_vm1, %v1811_v56 }
 0x213   : > { %903 = vmatpush.msrb.mxu2 %v1461_v51  ;;  %932 = vmatpush.msrb.mxu3 %v1464_v53  ;;  %v819_v51 = vpop.permute.xlu2 %818 }
 0x214   : > { %1136 = vperm.xlu2 %1505, %v1121_v37  }
 0x216   : > { %1340 = vmatmul.msk.f32.gmra.mxu0 %vm525_vm1, %v1777_v45  ;;  %1343 = vmatmul.msk.f32.gmra.mxu1 %vm525_vm1, %v1777_v45 }
 0x21a   : > { %1345 = vmatmul.msk.f32.gmra.mxu2 %vm525_vm1, %v1789_v48  ;;  %1348 = vmatmul.msk.f32.gmra.mxu3 %vm525_vm1, %v1789_v48 }
 0x21b   : > { %v682_v48 = vpop.permute.xlu2 %681 }
 0x21c   : > { %1141 = vperm.xlu2 %1505, %v1122_v38  }
 0x21e   : > { %1350 = vmatmul.msk.f32.vlgmr.msrb.gmra.mxu0 %vm360_vm0, %v815_v62  ;;  %1354 = vmatmul.msk.f32.vlgmr.msrb.gmra.mxu1 %vm360_vm0, %v815_v62 }
 0x222   : > { %1346 = vmatmul.msk.f32.gmra.mxu2 %vm525_vm1, %v1777_v45  ;;  %1349 = vmatmul.msk.f32.gmra.mxu3 %vm525_vm1, %v1777_v45 }
 0x223   : > { %v821_v49 = vpop.permute.xlu2 %820 }
 0x224   : > { %1506 = vset.pattern.permute.xlu2 %v1571_v47 }
 0x226   : > { %1351 = vmatmul.msk.f32.gmra.mxu0 %vm360_vm0, %v817_v55  ;;  %1355 = vmatmul.msk.f32.gmra.mxu1 %vm360_vm0, %v817_v55 }
 0x22a   : > { %1358 = vmatmul.msk.f32.vlgmr.msrb.gmra.mxu2 %vm360_vm0, %v815_v62  ;;  %1362 = vmatmul.msk.f32.vlgmr.msrb.gmra.mxu3 %vm360_vm0, %v815_v62 }
 0x22b   : > { %v677_v56 = vpop.permute.xlu2 %676 }
 0x22e   : > { %1352 = vmatmul.msk.f32.gmra.mxu0 %vm360_vm0, %v819_v51  ;;  %1356 = vmatmul.msk.f32.gmra.mxu1 %vm360_vm0, %v819_v51 }
 0x232   : > { %1359 = vmatmul.msk.f32.gmra.mxu2 %vm360_vm0, %v817_v55  ;;  %1363 = vmatmul.msk.f32.gmra.mxu3 %vm360_vm0, %v817_v55 }
 0x233   : > { %v672_v1 = vpop.permute.xlu2 %671 }
 0x236   : > { %1353 = vmatmul.msk.f32.gmra.mxu0 %vm360_vm0, %v821_v49  ;;  %1357 = vmatmul.msk.f32.gmra.mxu1 %vm360_vm0, %v821_v49 }
 0x23a   : > { %1360 = vmatmul.msk.f32.gmra.mxu2 %vm360_vm0, %v819_v51  ;;  %1364 = vmatmul.msk.f32.gmra.mxu3 %vm360_vm0, %v819_v51 }
 0x242   : > { %1361 = vmatmul.msk.f32.gmra.mxu2 %vm360_vm0, %v821_v49  ;;  %1365 = vmatmul.msk.f32.gmra.mxu3 %vm360_vm0, %v821_v49 }
 0x283   : > { %v707_v45 = vpop.f32.mrf.mxu0  ;;  %v733_v53 = vpop.f32.mrf.mxu1 }
 0x284   : > { %v708_v6 = vadd.f32 %v707_v45, %v672_v1  ;;  %v734_v7 = vadd.f32 %v733_v53, %v672_v1 }
 0x286   : > { %v794_v13 = vmax.f32 %v708_v6, 0.0  ;;  %v795_v9 = vmax.f32 %v734_v7, 0.0 }
 0x28b   : > { %v710_v21 = vpop.f32.mrf.mxu0  ;;  %v736_v60 = vpop.f32.mrf.mxu1 }
 0x28c   : > { %v711_v2 = vadd.f32 %v710_v21, %v677_v56  ;;  %v737_v16 = vadd.f32 %v736_v60, %v677_v56 }
 0x28e   : > { %v798_v11 = vmax.f32 %v711_v2, 0.0  ;;  %v799_v12 = vmax.f32 %v737_v16, 0.0 }
 0x293   : > { %v713_v61 = vpop.f32.mrf.mxu0  ;;  %v739_v0 = vpop.f32.mrf.mxu1 }
 0x294   : > { %v714_v44 = vadd.f32 %v713_v61, %v682_v48  ;;  %v740_v3 = vadd.f32 %v739_v0, %v682_v48 }
 0x295   : > { %v759_v4 = vpop.f32.mrf.mxu2  ;;  %v785_v5 = vpop.f32.mrf.mxu3 }
 0x296   : > { %v802_v8 = vmax.f32 %v714_v44, 0.0  ;;  %v803_v10 = vmax.f32 %v740_v3, 0.0  ;;  %v760_v27 = vadd.f32 %v759_v4, %v672_v1  ;;  %v786_v29 = vadd.f32 %v785_v5, %v672_v1  ;;  %v1077_v1 = vpop.permute.xlu0 %1076  ;;  %v1081_v44 = vpop.permute.xlu1 %1080 }
 0x298   : > { %968 = vmatpush.msra.mxu0 %v802_v8  ;;  %997 = vmatpush.msra.mxu1 %v803_v10  ;;  %v796_v34 = vmax.f32 %v760_v27, 0.0  ;;  %v797_v36 = vmax.f32 %v786_v29, 0.0 }
 0x29a   : > { %969 = vmatpush.msra.mxu0 %v798_v11  ;;  %998 = vmatpush.msra.mxu1 %v799_v12 }
 0x29b   : > { %v876_v39 = vpop.f32.mrf.mxu1 }
 0x29c   : > { %970 = vmatpush.msra.mxu0 %v794_v13  ;;  %999 = vmatpush.msra.mxu1 %v795_v9 }
 0x29d   : > { %v762_v14 = vpop.f32.mrf.mxu2  ;;  %v788_v15 = vpop.f32.mrf.mxu3  ;;  %1366 = vmatmul.msk.f32.vlgmr.msra.gmra.mxu0 %vm946_vm2, %v1755_v35  ;;  %1370 = vmatmul.msk.f32.vlgmr.msra.gmra.mxu1 %vm946_vm2, %v1755_v35 }
 0x29e   : > { %v763_v22 = vadd.f32 %v762_v14, %v677_v56  ;;  %v789_v23 = vadd.f32 %v788_v15, %v677_v56 }
 0x2a0   : > { %v800_v32 = vmax.f32 %v763_v22, 0.0  ;;  %v801_v33 = vmax.f32 %v789_v23, 0.0 }
 0x2a3   : > { %v879_v41 = vpop.f32.mrf.mxu1 }
 0x2a5   : > { %v765_v19 = vpop.f32.mrf.mxu2  ;;  %v791_v20 = vpop.f32.mrf.mxu3  ;;  %1367 = vmatmul.msk.f32.gmra.mxu0 %vm946_vm2, %v1765_v42  ;;  %1371 = vmatmul.msk.f32.gmra.mxu1 %vm946_vm2, %v1765_v42 }
 0x2a6   : > { %v766_v24 = vadd.f32 %v765_v19, %v682_v48  ;;  %v792_v25 = vadd.f32 %v791_v20, %v682_v48 }
 0x2a8   : > { %v804_v30 = vmax.f32 %v766_v24, 0.0  ;;  %v805_v31 = vmax.f32 %v792_v25, 0.0 }
 0x2aa   : > { %1026 = vmatpush.msra.mxu2 %v804_v30  ;;  %1055 = vmatpush.msra.mxu3 %v805_v31 }
 0x2ab   : > { %v882_v58 = vpop.f32.mrf.mxu1 }
 0x2ac   : > { %1027 = vmatpush.msra.mxu2 %v800_v32  ;;  %1056 = vmatpush.msra.mxu3 %v801_v33 }
 0x2ad   : > { %1368 = vmatmul.msk.f32.gmra.mxu0 %vm946_vm2, %v1771_v43  ;;  %1372 = vmatmul.msk.f32.gmra.mxu1 %vm946_vm2, %v1771_v43  ;;  %v1982_v52 = vpop.f32.mrf.mxu2  ;;  %v1984_v59 = vpop.f32.mrf.mxu3 }
 0x2ae   : > { %1028 = vmatpush.msra.mxu2 %v796_v34  ;;  %1057 = vmatpush.msra.mxu3 %v797_v36 }
 0x2af   : > { %1374 = vmatmul.msk.f32.vlgmr.msra.gmra.mxu2 %vm946_vm2, %v1755_v35  ;;  %1378 = vmatmul.msk.f32.vlgmr.msra.gmra.mxu3 %vm946_vm2, %v1755_v35  ;;  %v1123_v35 = vld [vmem:[%s2065_s1 + $0x78] sm:$0x1] }
 0x2b0   : > { %1198 = vperm.xlu2 %1506, %v1123_v35  }
 0x2b3   : > { %v885_v62 = vpop.f32.mrf.mxu1 }
 0x2b5   : > { %1369 = vmatmul.msk.f32.gmra.mxu0 %vm946_vm2, %v1783_v46  ;;  %1373 = vmatmul.msk.f32.gmra.mxu1 %vm946_vm2, %v1783_v46  ;;  %v908_v28 = vpop.f32.mrf.mxu2  ;;  %v937_v50 = vpop.f32.mrf.mxu3 }
 0x2b7   : > { %1375 = vmatmul.msk.f32.gmra.mxu2 %vm946_vm2, %v1765_v42  ;;  %1379 = vmatmul.msk.f32.gmra.mxu3 %vm946_vm2, %v1765_v42  ;;  %v847_v42 = vpop.f32.mrf.mxu0 }
 0x2bd   : > { %v911_v49 = vpop.f32.mrf.mxu2  ;;  %v940_v45 = vpop.f32.mrf.mxu3 }
 0x2bf   : > { %1376 = vmatmul.msk.f32.gmra.mxu2 %vm946_vm2, %v1771_v43  ;;  %1380 = vmatmul.msk.f32.gmra.mxu3 %vm946_vm2, %v1771_v43  ;;  %v850_v40 = vpop.f32.mrf.mxu0  ;;  %v1980_v43 = vpop.permute.xlu2 %1072 }
 0x2c5   : > { %v1992_v60 = vpop.f32.mrf.mxu2  ;;  %v1994_v61 = vpop.f32.mrf.mxu3 }
 0x2c7   : > { %1377 = vmatmul.msk.f32.gmra.mxu2 %vm946_vm2, %v1783_v46  ;;  %1381 = vmatmul.msk.f32.gmra.mxu3 %vm946_vm2, %v1783_v46  ;;  %v853_v57 = vpop.f32.mrf.mxu0  ;;  %v1986_v63 = vpop.permute.xlu2 %1084 }
 0x2cf   : > { %v856_v47 = vpop.f32.mrf.mxu0  ;;  %v1988_v55 = vpop.permute.xlu2 %1126 }
 0x2d7   : > { %v1990_v53 = vpop.permute.xlu2 %1131 }
 0x2df   : > { %v1996_v3 = vpop.permute.xlu2 %1136 }
 0x2e7   : > { %v2002_v27 = vpop.permute.xlu2 %1141 }
 0x31a   : > { %v972_v54 = vpop.f32.mrf.mxu0  ;;  %v1001_v46 = vpop.f32.mrf.mxu1 }
 0x31b   : > { %v1002_v2 = vadd.f32 %v1001_v46, %v876_v39  ;;  %v973_v13 = vadd.f32 %v972_v54, %v847_v42 }
 0x31d   : > { %v1088_v6 = vadd.f32 %v1980_v43, %v1002_v2  ;;  %v1087_v23 = vadd.f32 %v1980_v43, %v973_v13 }
 0x31f   : > { %v1104_v18 = vmax.f32 %v1088_v6, 0.0  ;;  %v1103_v36 = vmax.f32 %v1087_v23, 0.0 }
 0x321   : > { %v1145_v29 = vmul.f32 %v1988_v55, %v1104_v18 }
 0x322   : > { %v975_v51 = vpop.f32.mrf.mxu0  ;;  %v1004_v48 = vpop.f32.mrf.mxu1 }
 0x323   : > { %v1005_v0 = vadd.f32 %v1004_v48, %v879_v41  ;;  %v976_v7 = vadd.f32 %v975_v51, %v850_v40  ;;  %v1144_v41 = vmul.f32 %v1988_v55, %v1103_v36 }
 0x325   : > { %v1092_v4 = vadd.f32 %v1077_v1, %v1005_v0  ;;  %v1091_v19 = vadd.f32 %v1077_v1, %v976_v7 }
 0x327   : > { %v1108_v14 = vmax.f32 %v1092_v4, 0.0  ;;  %v1107_v30 = vmax.f32 %v1091_v19, 0.0 }
 0x329   : > { %v1149_v24 = vmul.f32 %v1990_v53, %v1108_v14  ;;  %v1148_v42 = vmul.f32 %v1990_v53, %v1107_v30 }
 0x32a   : > { %v978_v56 = vpop.f32.mrf.mxu0  ;;  %v1007_v21 = vpop.f32.mrf.mxu1 }
 0x32b   : > { %v1008_v16 = vadd.f32 %v1007_v21, %v882_v58  ;;  %v979_v15 = vadd.f32 %v978_v56, %v853_v57  ;;  %v1169_v37 = vadd.f32 %v1149_v24, %v1145_v29  ;;  %v1160_v51 = vadd.f32 %v1148_v42, %v1144_v41 }
 0x32d   : > { %v1096_v8 = vadd.f32 %v1081_v44, %v1008_v16  ;;  %v1095_v25 = vadd.f32 %v1081_v44, %v979_v15 }
 0x32f   : > { %v1112_v20 = vmax.f32 %v1096_v8, 0.0  ;;  %v1111_v38 = vmax.f32 %v1095_v25, 0.0 }
 0x331   : > { %v1153_v31 = vmul.f32 %v1996_v3, %v1112_v20 }
 0x332   : > { %v1010_v5 = vpop.f32.mrf.mxu1  ;;  %v1030_v11 = vpop.f32.mrf.mxu2 }
 0x333   : > { %v1011_v10 = vadd.f32 %v1010_v5, %v885_v62  ;;  %v1059_v12 = vpop.f32.mrf.mxu3  ;;  %v981_v9 = vpop.f32.mrf.mxu0  ;;  %v1170_v39 = vadd.f32 %v1169_v37, %v1153_v31  ;;  %v1031_v62 = vadd.f32 %v1030_v11, %v1982_v52 }
 0x334   : > { %v982_v22 = vadd.f32 %v981_v9, %v856_v47  ;;  %v1152_v47 = vmul.f32 %v1996_v3, %v1111_v38  ;;  %v1060_v54 = vadd.f32 %v1059_v12, %v1984_v59 }
 0x335   : > { %v1100_v17 = vadd.f32 %v1986_v63, %v1011_v10 }
 0x336   : > { %v1099_v32 = vadd.f32 %v1986_v63, %v982_v22  ;;  %v1161_v5 = vadd.f32 %v1160_v51, %v1152_v47 }
 0x337   : > { %v1116_v26 = vmax.f32 %v1100_v17, 0.0 }
 0x338   : > { %v1115_v40 = vmax.f32 %v1099_v32, 0.0 }
 0x339   : > { %v1157_v35 = vmul.f32 %v2002_v27, %v1116_v26 }
 0x33a   : > { %v1033_v33 = vpop.f32.mrf.mxu2  ;;  %v1156_v48 = vmul.f32 %v2002_v27, %v1115_v40 }
 0x33b   : > { %v1062_v34 = vpop.f32.mrf.mxu3  ;;  %v1034_v57 = vadd.f32 %v1033_v33, %v908_v28  ;;  %v1171_v46 = vadd.f32 %v1170_v39, %v1157_v35  ;;  %v1089_v28 = vadd.f32 %v1980_v43, %v1031_v62 }
 0x33c   : > { %v1063_v58 = vadd.f32 %v1062_v34, %v937_v50  ;;  %v1090_v50 = vadd.f32 %v1980_v43, %v1060_v54  ;;  %v1162_v8 = vadd.f32 %v1161_v5, %v1156_v48 }
 0x33d   : > { %v1093_v0 = vadd.f32 %v1077_v1, %v1034_v57  ;;  %v1172_v6 = vrot.slane %v1171_v46, 4  ;;  %v1105_v11 = vmax.f32 %v1089_v28, 0.0 }
 0x33e   : > { %v1094_v2 = vadd.f32 %v1077_v1, %v1063_v58  ;;  %v1106_v12 = vmax.f32 %v1090_v50, 0.0  ;;  %v1163_v15 = vrot.slane %v1162_v8, 4  ;;  %v1199_v58 = vpop.permute.xlu2 %1198 }
 0x33f   : > { %v1109_v59 = vmax.f32 %v1093_v0, 0.0  ;;  %v1173_v13 = vadd.f32 %v1172_v6, %v1171_v46  ;;  %v1219_v0 = vlaneseq }
 0x340   : > { %v1110_v10 = vmax.f32 %v1094_v2, 0.0  ;;  %v1147_v19 = vmul.f32 %v1988_v55, %v1106_v12  ;;  %v1164_v26 = vadd.f32 %v1163_v15, %v1162_v8 }
 0x341   : > { %v1174_v20 = vrot.slane %v1173_v13, 2  ;;  %vm1221_vm6 = vcmp.lt.s32.totalorder %v1219_v0, 512 }
 0x342   : > { %v1036_v56 = vpop.f32.mrf.mxu2  ;;  %v1151_v17 = vmul.f32 %v1990_v53, %v1110_v10  ;;  %v1165_v34 = vrot.slane %v1164_v26, 2 }
 0x343   : > { %v1065_v21 = vpop.f32.mrf.mxu3  ;;  %v1037_v16 = vadd.f32 %v1036_v56, %v911_v49  ;;  %v1175_v31 = vadd.f32 %v1174_v20, %v1173_v13 }
 0x344   : > { %v1066_v4 = vadd.f32 %v1065_v21, %v940_v45  ;;  %v1150_v45 = vmul.f32 %v1990_v53, %v1109_v59  ;;  %v1187_v53 = vadd.f32 %v1151_v17, %v1147_v19  ;;  %v1166_v35 = vadd.f32 %v1165_v34, %v1164_v26 }
 0x345   : > { %v1097_v7 = vadd.f32 %v1081_v44, %v1037_v16  ;;  %v1176_v37 = vrot.slane %v1175_v31, 1 }
 0x346   : > { %v1098_v52 = vadd.f32 %v1081_v44, %v1066_v4  ;;  %v1146_v44 = vmul.f32 %v1988_v55, %v1105_v11  ;;  %v1167_v47 = vrot.slane %v1166_v35, 1 }
 0x347   : > { %v1113_v9 = vmax.f32 %v1097_v7, 0.0  ;;  %v1177_v40 = vadd.f32 %v1176_v37, %v1175_v31 }
 0x348   : > { %v1114_v14 = vmax.f32 %v1098_v52, 0.0  ;;  %v1178_v29 = vadd.f32 %v1150_v45, %v1146_v44  ;;  %v1168_v48 = vadd.f32 %v1167_v47, %v1166_v35 }
 0x349   : > { %v1154_v22 = vmul.f32 %v1996_v3, %v1113_v9 }
 0x34a   : > { %v1039_v1 = vpop.f32.mrf.mxu2  ;;  %v1155_v23 = vmul.f32 %v1996_v3, %v1114_v14  ;;  %v1201_v5 = vadd.f32 %v1199_v58, %v1168_v48 }
 0x34b   : > { %v1068_v49 = vpop.f32.mrf.mxu3  ;;  %v1040_v43 = vadd.f32 %v1039_v1, %v1992_v60 }
 0x34c   : > { %v1069_v18 = vadd.f32 %v1068_v49, %v1994_v61  ;;  %v1179_v61 = vadd.f32 %v1178_v29, %v1154_v22  ;;  %v1188_v32 = vadd.f32 %v1187_v53, %v1155_v23 }
 0x34d   : > { %v1101_v24 = vadd.f32 %v1986_v63, %v1040_v43 }
 0x34e   : > { %v1102_v25 = vadd.f32 %v1986_v63, %v1069_v18 }
 0x34f   : > { %v1117_v30 = vmax.f32 %v1101_v24, 0.0 }
 0x350   : > { %v1118_v60 = vmax.f32 %v1102_v25, 0.0 }
 0x351   : > { %v1158_v55 = vmul.f32 %v2002_v27, %v1117_v30 }
 0x352   : > { %v1159_v33 = vmul.f32 %v2002_v27, %v1118_v60  ;;  %v1202_v27 = vadd.f32 %v1199_v58, %v1177_v40 }
 0x353   : > { %v1180_v36 = vadd.f32 %v1179_v61, %v1158_v55 }
 0x354   : > { %v1189_v3 = vadd.f32 %v1188_v32, %v1159_v33  ;;  %v1209_v2 = vrot.slane %v1202_v27, 7 }
 0x355   : > { %v1181_v63 = vrot.slane %v1180_v36, 4 }
 0x356   : > { %v1190_v38 = vrot.slane %v1189_v3, 4  ;;  %v1213_v6 = vsel %vm1212_vm3, %v1201_v5, %v1209_v2 }
 0x357   : > { %v1182_v42 = vadd.f32 %v1181_v63, %v1180_v36 }
 0x358   : > { %v1191_v39 = vadd.f32 %v1190_v38, %v1189_v3 }
 0x359   : > { %v1183_v41 = vrot.slane %v1182_v42, 2 }
 0x35a   : > { %v1192_v57 = vrot.slane %v1191_v39, 2 }
 0x35b   : > { %v1184_v62 = vadd.f32 %v1183_v41, %v1182_v42 }
 0x35c   : > { %v1193_v54 = vadd.f32 %v1192_v57, %v1191_v39 }
 0x35d   : > { %v1185_v46 = vrot.slane %v1184_v62, 1 }
 0x35e   : > { %v1194_v51 = vrot.slane %v1193_v54, 1 }
 0x35f   : > { %v1186_v56 = vadd.f32 %v1185_v46, %v1184_v62 }
 0x360   : > { %v1195_v21 = vadd.f32 %v1194_v51, %v1193_v54 }
 0x361   : > { %v1203_v16 = vadd.f32 %v1199_v58, %v1186_v56 }
 0x362   : > { %v1204_v4 = vadd.f32 %v1199_v58, %v1195_v21 }
 0x363   : > { %v1210_v28 = vrot.slane %v1203_v16, 6 }
 0x364   : > { %v1211_v50 = vrot.slane %v1204_v4, 5 }
 0x366   : > { %v1215_v7 = vsel %vm1214_vm4, %v1210_v28, %v1211_v50 }
 0x367   : > { %v1217_v52 = vsel %vm1216_vm5, %v1213_v6, %v1215_v7 }
 0x368   : > { %1223 = vst.msk [vmem:[%s137_s7] sm:$0xf] %vm1221_vm6, %v1217_v52 }
 0x369   : > { %1534 = shalt.err (!%p1531_p3)
}
 0x36a   : > { %1386 = dma.vmem_to_hbm [thread:$0]  (%p1627_p5), %s1238_s8, 64, %s1240_s13, %s1225_s14  }
 0x36b PF: > { %p1392_p4 = scmp.ge.s32.totalorder %s1569_s12, 2  ;;  %s1251_s27 = sand.u32 1, %s1557_s9  }
 0x36c   : > { %s1252_s28 = scalar_lea.sflag [#allocation3], %s1251_s27 }
 0x36d   : > { %p1389_p7 = pnand %p1392_p4, %p1631_p6 }
 0x36f   : > { %p1390_p8 = pneg %p1389_p7 }
 0x371   : > { %1552 = dma.done.wait (%p1390_p8), %s1252_s28, 64  }
 0x372   : > { %1554 = vsyncadd (%p1390_p8), %s1252_s28, 4294967232  ;;  %p12_p9 = scmp.ge.s32.totalorder %s1614_s15, 4   ;;  %s2069_s9 = smov %s1561_s10 }
 0x373   : > { %s2070_s10 = smov %s1565_s11  ;;  %s2071_s11 = smov %s1625_s18 }
 0x374   : > { %s2072_s12 = smov %s1614_s15  ;;  %14 = sbr.rel (!%p12_p9) target bundleno = 3 (0x3), region = 63 }
 0x379   :  { %1258 = vsyncpa [#allocation3], 1 }
 0x37a   :  { %1260 = vsyncpa [#allocation3 + $0x1], 1 }

</bundles_post_ra>
